<compile_context>
chip_gen: v6e
topology: v6e:2x2x1
jax: 0.10.0
libtpu: 0.0.40
codegen_flags: <defaults>
</compile_context>

<pallas_src>
import functools

import jax
import jax.numpy as jnp
from jax.experimental import pallas as pl
from jax.experimental.pallas import tpu as pltpu

_NUM_SPLITS = 2  # megacore-friendly leading parallel axis (v7x); serial elsewhere


def _round_up(x, m):
    return ((x + m - 1) // m) * m


def _choose_tb(batch, embed, n_noise, itemsize, budget_bytes=24 * 1024 * 1024):
    """Largest batch tile whose VMEM working set fits a conservative budget."""
    lane = 128
    # Per batch row: double-buffered iv/ov/nv input blocks (lane-padded) plus the
    # (single-buffered, lane-padded f32) accumulator scratch row.
    in_row = (2 * _round_up(embed, lane) + _round_up(n_noise * embed, lane)) * itemsize
    acc_row = lane * 4
    tb = budget_bytes // (2 * in_row + acc_row)
    tb = max(8, min(4096, (tb // 8) * 8))  # sublane-aligned, capped
    # No point tiling larger than one split's worth of rows.
    per_split = _round_up(pl.cdiv(batch, _NUM_SPLITS), 8)
    return min(tb, per_split)


def _loss_kernel(iv_ref, ov_ref, nv_ref, rep_ref, sel_ref, ones_ref,
                 out_ref, acc_ref, *, batch):
    c = pl.program_id(0)          # megacore split
    t = pl.program_id(1)          # reduction step within the split
    n_t = pl.num_programs(1)

    @pl.when(t == 0)
    def _():
        acc_ref[...] = jnp.zeros_like(acc_ref)

    iv = iv_ref[...].astype(jnp.float32)            # (TB, E)
    ov = ov_ref[...].astype(jnp.float32)            # (TB, E)
    nv = nv_ref[...].astype(jnp.float32)            # (TB, N*E)  flat, lane-dense
    tb = iv.shape[0]

    # E-reductions and the iv replication go to the otherwise-idle MXU:
    #   out_dot[b]    = sum_e iv[b,e]*ov[b,e]
    #   iv_rep[b,j]   = iv[b, j % E]
    #   noise_dot[b,n]= sum_e nv[b,n*E+e]*iv[b,e]
    out_dot = jnp.dot(iv * ov, ones_ref[...], preferred_element_type=jnp.float32)      # (TB, 1)
    iv_rep = jnp.dot(iv, rep_ref[...], preferred_element_type=jnp.float32)              # (TB, N*E)
    noise_dot = jnp.dot(nv * iv_rep, sel_ref[...], preferred_element_type=jnp.float32)  # (TB, N)

    # Mask tail / out-of-range rows BEFORE the transcendentals (no wrapper padding,
    # so overhanging blocks carry unspecified data).
    row0 = (c * n_t + t) * tb
    ridx = row0 + jax.lax.broadcasted_iota(jnp.int32, (tb, 1), 0)
    valid = ridx < batch
    out_dot = jnp.where(valid, out_dot, 0.0)
    noise_dot = jnp.where(valid, noise_dot, 0.0)

    # Numerically stable logsigmoid, applied separately (no lane concat).
    pos = jnp.minimum(out_dot, 0.0) - jnp.log1p(jnp.exp(-jnp.abs(out_dot)))
    neg = jnp.minimum(-noise_dot, 0.0) - jnp.log1p(jnp.exp(-jnp.abs(noise_dot)))

    per_row = pos + jnp.sum(neg, axis=-1, keepdims=True)       # (TB, 1)
    per_row = jnp.where(valid, per_row, 0.0)
    acc_ref[...] += per_row

    # Cross-sublane reduction + store only on the last reduction step.
    @pl.when(t == n_t - 1)
    def _():
        out_ref[...] = jnp.zeros_like(out_ref) + jnp.sum(acc_ref[...])


def skipgram_loss(input_vectors, output_vectors, noise_vectors):
    """Pallas TPU implementation of the PyTorch `Loss.forward`."""
    B, E = input_vectors.shape
    _, N, _ = noise_vectors.shape
    itemsize = jnp.dtype(input_vectors.dtype).itemsize

    TB = _choose_tb(B, E, N, itemsize)
    T = pl.cdiv(B, _NUM_SPLITS * TB)            # reduction steps per split
    last_blk = pl.cdiv(B, TB) - 1               # clamp so DMA starts stay in bounds

    # Dense 2-D layout for the noise block (free reshape: same contiguous memory).
    nv2 = noise_vectors.reshape(B, N * E)

    # Constant MXU helper matrices (resident: block index never changes).
    col = jnp.arange(N * E, dtype=jnp.int32)
    rep = (col[None, :] % E == jnp.arange(E, dtype=jnp.int32)[:, None]).astype(jnp.float32)   # (E, N*E)
    sel = (col[:, None] // E == jnp.arange(N, dtype=jnp.int32)[None, :]).astype(jnp.float32)  # (N*E, N)
    ones_e = jnp.ones((E, 1), jnp.float32)

    kernel = functools.partial(_loss_kernel, batch=B)

    def _row_map(c, t):
        return (jnp.minimum(c * T + t, last_blk), 0)

    partials = pl.pallas_call(
        kernel,
        out_shape=jax.ShapeDtypeStruct((_NUM_SPLITS, 1, 1), jnp.float32),
        grid_spec=pltpu.PrefetchScalarGridSpec(
            num_scalar_prefetch=0,
            grid=(_NUM_SPLITS, T),
            in_specs=[
                pl.BlockSpec((TB, E), _row_map),
                pl.BlockSpec((TB, E), _row_map),
                pl.BlockSpec((TB, N * E), _row_map),
                pl.BlockSpec((E, N * E), lambda c, t: (0, 0)),
                pl.BlockSpec((N * E, N), lambda c, t: (0, 0)),
                pl.BlockSpec((E, 1), lambda c, t: (0, 0)),
            ],
            out_specs=pl.BlockSpec((1, 1, 1), lambda c, t: (c, 0, 0)),
            scratch_shapes=[pltpu.VMEM((TB, 1), jnp.float32)],
        ),
        compiler_params=pltpu.CompilerParams(
            dimension_semantics=("parallel", "arbitrary"),
            vmem_limit_bytes=32 * 1024 * 1024,
        ),
        cost_estimate=pl.CostEstimate(
            flops=int(2 * B * E * (N * E) + 2 * B * (N * E) * N + 4 * B * E + 2 * B * N * E),
            transcendentals=int(2 * B * (N + 1)),
            bytes_accessed=int(itemsize * B * (N + 2) * E + 4 * _NUM_SPLITS),
        ),
    )(input_vectors, output_vectors, nv2, rep, sel, ones_e)

    # Per-split partial sums -> mean over the true batch size, negated.
    return -(jnp.sum(partials) / B)


def _reference_loss(iv, ov, nv):
    # Pure-JAX reference mirroring the PyTorch module exactly.
    out_dot = jnp.einsum("be,be->b", ov, iv)
    out_loss = jnp.log(jax.nn.sigmoid(out_dot))
    noise_dot = jnp.einsum("bne,be->bn", -nv, iv)
    noise_loss = jnp.log(jax.nn.sigmoid(noise_dot)).sum(axis=1)
    return -(out_loss + noise_loss).mean()


if __name__ == "__main__":
    B, E, N = 8, 32, 5  # batch, embed size, negative samples

    key = jax.random.PRNGKey(0)
    k_in, k_out, k_noise = jax.random.split(key, 3)
    input_vectors = jax.random.normal(k_in, (B, E), dtype=jnp.float32)
    output_vectors = jax.random.normal(k_out, (B, E), dtype=jnp.float32)
    noise_vectors = jax.random.normal(k_noise, (B, N, E), dtype=jnp.float32)

    loss = jax.block_until_ready(skipgram_loss(input_vectors, output_vectors, noise_vectors))
    ref = _reference_loss(input_vectors, output_vectors, noise_vectors)
    assert jnp.allclose(loss, ref, rtol=1e-5, atol=1e-5), (loss, ref)

    print("KERNEL_OK")
</pallas_src>

<mosaic_0001>
module attributes {stable_mosaic.version = 11 : i64} {
  func.func @_loss_kernel(%arg0: i32, %arg1: i32, %arg2: memref<8x32xf32, #tpu.memory_space<vmem>>, %arg3: memref<8x32xf32, #tpu.memory_space<vmem>>, %arg4: memref<8x160xf32, #tpu.memory_space<vmem>>, %arg5: memref<32x160xf32, #tpu.memory_space<vmem>>, %arg6: memref<160x5xf32, #tpu.memory_space<vmem>>, %arg7: memref<32x1xf32, #tpu.memory_space<vmem>>, %arg8: memref<1x1x1xf32, #tpu.memory_space<vmem>>, %arg9: memref<8x1xf32, #tpu.memory_space<vmem>>) attributes {dimension_semantics = [#tpu.dimension_semantics<parallel>, #tpu.dimension_semantics<arbitrary>], iteration_bounds = array<i64: 2, 1>, scalar_prefetch = 0 : i64, scratch_operands = 1 : i64, tpu.core_type = #tpu.core_type<tc>, window_params = [{transform_indices = @transform_0, window_bounds = array<i64: 8, 32>}, {transform_indices = @transform_1, window_bounds = array<i64: 8, 32>}, {transform_indices = @transform_2, window_bounds = array<i64: 8, 160>}, {pipeline_mode = #tpu.pipeline_mode<synchronous>, transform_indices = @transform_3, window_bounds = array<i64: 32, 160>}, {pipeline_mode = #tpu.pipeline_mode<synchronous>, transform_indices = @transform_4, window_bounds = array<i64: 160, 5>}, {pipeline_mode = #tpu.pipeline_mode<synchronous>, transform_indices = @transform_5, window_bounds = array<i64: 32, 1>}, {transform_indices = @transform_6, window_bounds = array<i64: 1, 1, 1>}]} {
    %c0_i32 = arith.constant 0 : i32
    %0 = arith.cmpi eq, %arg1, %c0_i32 : i32
    %1 = arith.extui %0 : i1 to i32
    %c0_i32_0 = arith.constant 0 : i32
    %2 = arith.cmpi ne, %1, %c0_i32_0 : i32
    scf.if %2 {
      %cst_30 = arith.constant 0.000000e+00 : f32
      %57 = vector.broadcast %cst_30 : f32 to vector<8x1xf32>
      %c0_31 = arith.constant 0 : index
      %c0_32 = arith.constant 0 : index
      %58 = vector.load %arg9[%c0_31, %c0_32] : memref<8x1xf32, #tpu.memory_space<vmem>>, vector<8x1xf32>
      tpu.vector_store %arg9[%c0_31, %c0_32], %57 {strides = array<i32>} : memref<8x1xf32, #tpu.memory_space<vmem>>, vector<8x1xf32>,
    } else {
    }
    %c0 = arith.constant 0 : index
    %c0_1 = arith.constant 0 : index
    %3 = vector.load %arg2[%c0, %c0_1] : memref<8x32xf32, #tpu.memory_space<vmem>>, vector<8x32xf32>
    %c0_2 = arith.constant 0 : index
    %c0_3 = arith.constant 0 : index
    %4 = vector.load %arg3[%c0_2, %c0_3] : memref<8x32xf32, #tpu.memory_space<vmem>>, vector<8x32xf32>
    %c0_4 = arith.constant 0 : index
    %c0_5 = arith.constant 0 : index
    %5 = vector.load %arg4[%c0_4, %c0_5] : memref<8x160xf32, #tpu.memory_space<vmem>>, vector<8x160xf32>
    %6 = arith.mulf %3, %4 : vector<8x32xf32>
    %c0_6 = arith.constant 0 : index
    %c0_7 = arith.constant 0 : index
    %7 = vector.load %arg7[%c0_6, %c0_7] : memref<32x1xf32, #tpu.memory_space<vmem>>, vector<32x1xf32>
    %cst = arith.constant dense<0.000000e+00> : vector<8x1xf32>
    %8 = tpu.matmul %6, %7, %cst {dimension_numbers = #tpu.dot_dimension_numbers<[1], [0], [0], [1], [0, 0, 1, 1], [], []>} : vector<8x32xf32>, vector<32x1xf32>, vector<8x1xf32> -> vector<8x1xf32>
    %c0_8 = arith.constant 0 : index
    %c0_9 = arith.constant 0 : index
    %9 = vector.load %arg5[%c0_8, %c0_9] : memref<32x160xf32, #tpu.memory_space<vmem>>, vector<32x160xf32>
    %cst_10 = arith.constant dense<0.000000e+00> : vector<8x160xf32>
    %10 = tpu.matmul %3, %9, %cst_10 {dimension_numbers = #tpu.dot_dimension_numbers<[1], [0], [0], [1], [0, 0, 1, 1], [], []>} : vector<8x32xf32>, vector<32x160xf32>, vector<8x160xf32> -> vector<8x160xf32>
    %11 = arith.mulf %5, %10 : vector<8x160xf32>
    %c0_11 = arith.constant 0 : index
    %c0_12 = arith.constant 0 : index
    %12 = vector.load %arg6[%c0_11, %c0_12] : memref<160x5xf32, #tpu.memory_space<vmem>>, vector<160x5xf32>
    %cst_13 = arith.constant dense<0.000000e+00> : vector<8x5xf32>
    %13 = tpu.matmul %11, %12, %cst_13 {dimension_numbers = #tpu.dot_dimension_numbers<[1], [0], [0], [1], [0, 0, 1, 1], [], []>} : vector<8x160xf32>, vector<160x5xf32>, vector<8x5xf32> -> vector<8x5xf32>
    %c1_i32 = arith.constant 1 : i32
    %14 = arith.muli %arg0, %c1_i32 : i32
    %15 = arith.addi %14, %arg1 : i32
    %c8_i32 = arith.constant 8 : i32
    %16 = arith.muli %15, %c8_i32 : i32
    %17 = tpu.iota {dimensions = array<i32: 0>} : vector<8x1xi32>
    %18 = vector.broadcast %16 : i32 to vector<8x1xi32>
    %19 = arith.addi %18, %17 : vector<8x1xi32>
    %c8_i32_14 = arith.constant 8 : i32
    %20 = vector.broadcast %c8_i32_14 : i32 to vector<8x1xi32>
    %21 = arith.cmpi slt, %19, %20 : vector<8x1xi32>
    %cst_15 = arith.constant 0.000000e+00 : f32
    %22 = vector.broadcast %cst_15 : f32 to vector<8x1xf32>
    %23 = arith.select %21, %8, %22 : vector<8x1xi1>, vector<8x1xf32>
    %cst_16 = arith.constant 0.000000e+00 : f32
    %24 = vector.shape_cast %21 : vector<8x1xi1> to vector<8x1xi1>
    %25 = vector.broadcast %24 : vector<8x1xi1> to vector<8x5xi1>
    %26 = vector.broadcast %cst_16 : f32 to vector<8x5xf32>
    %27 = arith.select %25, %13, %26 : vector<8x5xi1>, vector<8x5xf32>
    %cst_17 = arith.constant 0.000000e+00 : f32
    %28 = vector.broadcast %cst_17 : f32 to vector<8x1xf32>
    %29 = arith.minimumf %23, %28 : vector<8x1xf32>
    %30 = math.absf %23 : vector<8x1xf32>
    %cst_18 = arith.constant 0.000000e+00 : f32
    %31 = vector.broadcast %cst_18 : f32 to vector<8x1xf32>
    %32 = arith.subf %31, %30 : vector<8x1xf32>
    %33 = math.exp %32 : vector<8x1xf32>
    %34 = math.log1p %33 : vector<8x1xf32>
    %35 = arith.subf %29, %34 : vector<8x1xf32>
    %cst_19 = arith.constant 0.000000e+00 : f32
    %36 = vector.broadcast %cst_19 : f32 to vector<8x5xf32>
    %37 = arith.subf %36, %27 : vector<8x5xf32>
    %cst_20 = arith.constant 0.000000e+00 : f32
    %38 = vector.broadcast %cst_20 : f32 to vector<8x5xf32>
    %39 = arith.minimumf %37, %38 : vector<8x5xf32>
    %40 = math.absf %27 : vector<8x5xf32>
    %cst_21 = arith.constant 0.000000e+00 : f32
    %41 = vector.broadcast %cst_21 : f32 to vector<8x5xf32>
    %42 = arith.subf %41, %40 : vector<8x5xf32>
    %43 = math.exp %42 : vector<8x5xf32>
    %44 = math.log1p %43 : vector<8x5xf32>
    %45 = arith.subf %39, %44 : vector<8x5xf32>
    %cst_22 = arith.constant dense<0.000000e+00> : vector<8xf32>
    %46 = vector.multi_reduction <add>, %45, %cst_22 [1] : vector<8x5xf32> to vector<8xf32>
    %47 = vector.shape_cast %46 : vector<8xf32> to vector<8x1xf32>
    %48 = arith.addf %35, %47 : vector<8x1xf32>
    %cst_23 = arith.constant 0.000000e+00 : f32
    %49 = vector.broadcast %cst_23 : f32 to vector<8x1xf32>
    %50 = arith.select %21, %48, %49 : vector<8x1xi1>, vector<8x1xf32>
    %c0_24 = arith.constant 0 : index
    %c0_25 = arith.constant 0 : index
    %51 = vector.load %arg9[%c0_24, %c0_25] : memref<8x1xf32, #tpu.memory_space<vmem>>, vector<8x1xf32>
    %52 = arith.addf %51, %50 : vector<8x1xf32>
    %c0_26 = arith.constant 0 : index
    %c0_27 = arith.constant 0 : index
    %53 = vector.load %arg9[%c0_26, %c0_27] : memref<8x1xf32, #tpu.memory_space<vmem>>, vector<8x1xf32>
    tpu.vector_store %arg9[%c0_26, %c0_27], %52 {strides = array<i32>} : memref<8x1xf32, #tpu.memory_space<vmem>>, vector<8x1xf32>,
    %c0_i32_28 = arith.constant 0 : i32
    %54 = arith.cmpi eq, %arg1, %c0_i32_28 : i32
    %55 = arith.extui %54 : i1 to i32
    %c0_i32_29 = arith.constant 0 : i32
    %56 = arith.cmpi ne, %55, %c0_i32_29 : i32
    scf.if %56 {
      %cst_30 = arith.constant 0.000000e+00 : f32
      %57 = vector.broadcast %cst_30 : f32 to vector<1x1x1xf32>
      %c0_31 = arith.constant 0 : index
      %c0_32 = arith.constant 0 : index
      %58 = vector.load %arg9[%c0_31, %c0_32] : memref<8x1xf32, #tpu.memory_space<vmem>>, vector<8x1xf32>
      %59 = vector.shape_cast %58 : vector<8x1xf32> to vector<1x8x1xf32>
      %cst_33 = arith.constant dense<0.000000e+00> : vector<1xf32>
      %60 = vector.multi_reduction <add>, %59, %cst_33 [1, 2] : vector<1x8x1xf32> to vector<1xf32>
      %61 = vector.shape_cast %60 : vector<1xf32> to vector<1x1x1xf32>
      %62 = vector.extract %61[0, 0, 0] : f32 from vector<1x1x1xf32>
      %63 = vector.broadcast %62 : f32 to vector<1x1x1xf32>
      %64 = arith.addf %57, %63 : vector<1x1x1xf32>
      %c0_34 = arith.constant 0 : index
      %c0_35 = arith.constant 0 : index
      %c0_36 = arith.constant 0 : index
      %65 = vector.load %arg8[%c0_34, %c0_35, %c0_36] : memref<1x1x1xf32, #tpu.memory_space<vmem>>, vector<1x1x1xf32>
      tpu.vector_store %arg8[%c0_34, %c0_35, %c0_36], %64 {strides = array<i32>} : memref<1x1x1xf32, #tpu.memory_space<vmem>>, vector<1x1x1xf32>,
    } else {
    }
    return
  }
  func.func @transform_0(%arg0: i32, %arg1: i32) -> (i32, i32) {
    %c1_i32 = arith.constant 1 : i32
    %0 = arith.muli %arg0, %c1_i32 : i32
    %1 = arith.addi %0, %arg1 : i32
    %c0_i32 = arith.constant 0 : i32
    %2 = arith.minsi %1, %c0_i32 : i32
    %c0_i32_0 = arith.constant 0 : i32
    %c0_i32_1 = arith.constant 0 : i32
    return %2, %c0_i32_0 : i32, i32
  }
  func.func @transform_1(%arg0: i32, %arg1: i32) -> (i32, i32) {
    %c1_i32 = arith.constant 1 : i32
    %0 = arith.muli %arg0, %c1_i32 : i32
    %1 = arith.addi %0, %arg1 : i32
    %c0_i32 = arith.constant 0 : i32
    %2 = arith.minsi %1, %c0_i32 : i32
    %c0_i32_0 = arith.constant 0 : i32
    %c0_i32_1 = arith.constant 0 : i32
    return %2, %c0_i32_0 : i32, i32
  }
  func.func @transform_2(%arg0: i32, %arg1: i32) -> (i32, i32) {
    %c1_i32 = arith.constant 1 : i32
    %0 = arith.muli %arg0, %c1_i32 : i32
    %1 = arith.addi %0, %arg1 : i32
    %c0_i32 = arith.constant 0 : i32
    %2 = arith.minsi %1, %c0_i32 : i32
    %c0_i32_0 = arith.constant 0 : i32
    %c0_i32_1 = arith.constant 0 : i32
    return %2, %c0_i32_0 : i32, i32
  }
  func.func @transform_3(%arg0: i32, %arg1: i32) -> (i32, i32) {
    %c0_i32 = arith.constant 0 : i32
    %c0_i32_0 = arith.constant 0 : i32
    %c0_i32_1 = arith.constant 0 : i32
    return %c0_i32, %c0_i32_0 : i32, i32
  }
  func.func @transform_4(%arg0: i32, %arg1: i32) -> (i32, i32) {
    %c0_i32 = arith.constant 0 : i32
    %c0_i32_0 = arith.constant 0 : i32
    %c0_i32_1 = arith.constant 0 : i32
    return %c0_i32, %c0_i32_0 : i32, i32
  }
  func.func @transform_5(%arg0: i32, %arg1: i32) -> (i32, i32) {
    %c0_i32 = arith.constant 0 : i32
    %c0_i32_0 = arith.constant 0 : i32
    %c0_i32_1 = arith.constant 0 : i32
    return %c0_i32, %c0_i32_0 : i32, i32
  }
  func.func @transform_6(%arg0: i32, %arg1: i32) -> (i32, i32, i32) {
    %c0_i32 = arith.constant 0 : i32
    %c0_i32_0 = arith.constant 0 : i32
    %c0_i32_1 = arith.constant 0 : i32
    return %arg0, %c0_i32, %c0_i32_0 : i32, i32, i32
  }
}

</mosaic_0001>

<bundles_post_ra>
// kernel: tpu_custom_call.1
= control target key start
LH: loop header
LB: loop body
LE: loop exit
PB: predicated region body
PF: predicated region fallthrough
CT: control target
= control target key end

     0   :  { %s910_s21 = smov 0   ;;  %s912_s22 = smov 0   ;;  %s1092_s0 = inlined_call_operand.vmem [shape: f32[8,32], index: 0, kind: input, shape index: {}]   ;;  %s1093_s1 = inlined_call_operand.vmem [shape: f32[8,32], index: 1, kind: input, shape index: {}]   ;;  %s1094_s2 = inlined_call_operand.vmem [shape: f32[8,160], index: 2, kind: input, shape index: {}]   ;;  %s1095_s3 = inlined_call_operand.vmem [shape: f32[32,160], index: 3, kind: input, shape index: {}]   ;;  %s1096_s4 = inlined_call_operand.vmem [shape: f32[160,5], index: 4, kind: input, shape index: {}]   ;;  %s1097_s5 = inlined_call_operand.vmem [shape: f32[32,1], index: 5, kind: input, shape index: {}]   ;;  %s1098_s6 = inlined_call_operand.vmem [shape: f32[2,1,1], index: 6, kind: output, shape index: {}]  }
   0x1   :  { %s914_s23 = smov 0  }
   0x2 LB: > { %s28_s24 = sadd.s32 1, %s867_s22  ;;  %p776_p0 = scmp.ge.s32.totalorder %s871_s23, 1  ;;  %s871_s23 = sphi %s914_s23, %s16_s23   ;;  %s867_s22 = sphi %s912_s22, %s1100_s22   ;;  %s863_s21 = sphi %s910_s21, %s1099_s21  }
   0x3   : > { %p30_p1 = scmp.ge.s32.totalorder %s28_s24, 2  ;;  %p278_p2 = scmp.lt.s32.totalorder %s871_s23, 3 }
   0x5   : > { %s1102_s24 = smov (%p30_p1, %s28_s24), 0  ;;  %p279_p3 = pnand %p776_p0, %p278_p2 }
   0x6   : > { %p324_p4 = scmp.lt.s32.totalorder (!%p279_p3), %s863_s21, 0  ;;  %s793_s20 = sshll.u32 (!%p279_p3), %s863_s21, 3 }
   0x7   : > { %282 = sbr.rel (%p279_p3) target bundleno = 817 (0x331), region = 44  ;;  %p354_p5 = scmp.lt.s32.totalorder (!%p279_p3), %s863_s21, 1 }
   0xc   : > { %v371_v0 = vld [vmem:[%s1097_s5 + $0x18] sm:$0xff]  ;;  %v873_v1 = vmov 0.0   ;;  %v370_v2 = vld [vmem:[%s1097_s5 + $0x10] sm:$0xff]  ;;  %vm874_vm0 = vmmov 0   ;;  %s325_s29 = scalar_select %p324_p4, %s863_s21, 0  ;;  %v369_v3 = vld [vmem:[%s1097_s5 + $0x8] sm:$0xff]  ;;  %v625_v44 = vlaneseq  ;;  %v627_v46 = vstv %s793_s20 }
   0xd   : > { %802 = vmatprep.subr.mxu1 %v873_v1  ;;  %810 = vmatprep.mubr.msk.f32.mxu1 %vm874_vm0, %v873_v1  ;;  %v545_v4 = vld [vmem:[%s1096_s4 + $0x78] sm:$0xff]  ;;  %v544_v5 = vld [vmem:[%s1096_s4 + $0x70] sm:$0xff]  ;;  %v368_v6 = vld [vmem:[%s1097_s5] sm:$0xff]  ;;  %vm372_vm1 = vcmask 261120   ;;  %vm665_vm4 = vcmask 39936   ;;  %vm361_vm5 = vcmask 7168  }
   0xe   : > { %803 = vmatpush3.msra.mxu1 %v371_v0  ;;  %553 = vmatprep.subr.mxu0 %v873_v1  ;;  %s1104_s29 = smov (!%p324_p4, %s325_s29), 0  ;;  %v453_v7 = vld [vmem:[%s1095_s3 + $0x38] sm:$0xff]  ;;  %v543_v8 = vld [vmem:[%s1096_s4 + $0x68] sm:$0xff]  ;;  %v542_v11 = vld [vmem:[%s1096_s4 + $0x60] sm:$0xff]  ;;  %v626_v45 = vshrl.u32 %v625_v44, 7  ;;  %362 = vst.msk [vmem:[#allocation2] sm:$0xff] %vm361_vm5, %v873_v1 }
   0xf   : > { %804 = vmatprep.subr.mxu1 %v873_v1  ;;  %554 = vmatpush1.msra.mxu0 %v545_v4  ;;  %s780_s16 = sshll.u32 %s1104_s29, 3  ;;  %v452_v13 = vld [vmem:[%s1095_s3 + $0x30] sm:$0xff]  ;;  %v451_v14 = vld [vmem:[%s1095_s3 + $0x28] sm:$0xff]  ;;  %v450_v15 = vld [vmem:[%s1095_s3 + $0x20] sm:$0xff]  ;;  %s1106_s21 = smov (!%p354_p5, %s863_s21), 1  ;;  %vm691_vm7 = vcmask 0  }
  0x10   : > { %805 = vmatpush3.msra.mxu1 %v370_v2  ;;  %555 = vmatprep.subr.mxu0 %v873_v1  ;;  %s329_s25 = scalar_lea.vmem %s1092_s0, %s780_s16  ;;  %s339_s28 = scalar_lea.vmem %s1093_s1, %s780_s16  ;;  %v541_v16 = vld [vmem:[%s1096_s4 + $0x58] sm:$0xff]  ;;  %v448_v18 = vld [vmem:[%s1095_s3 + $0x10] sm:$0xff]  ;;  %v447_v20 = vld [vmem:[%s1095_s3 + $0x8] sm:$0xff]  ;;  %v628_v47 = vadd.s32 %v627_v46, %v626_v45 }
  0x11   : > { %806 = vmatprep.subr.mxu1 %v873_v1  ;;  %556 = vmatpush1.msra.mxu0 %v544_v5  ;;  %v363_v9 = vld [vmem:[%s329_s25] sm:$0xff]  ;;  %v449_v17 = vld [vmem:[%s1095_s3 + $0x18] sm:$0xff]  ;;  %v540_v19 = vld [vmem:[%s1096_s4 + $0x50] sm:$0xff]  ;;  %s796_s16 = sshll.u32 %s1104_s29, 4  ;;  %s356_s26 = scalar_lea.vmem %s1098_s6, %s1106_s21 }
  0x12   : > { %807 = vmatpush3.msra.mxu1 %v369_v3  ;;  %v364_v10 = vld [vmem:[%s339_s28] sm:$0xff]  ;;  %557 = vmatprep.subr.mxu0 %v873_v1  ;;  %v539_v22 = vld [vmem:[%s1096_s4 + $0x48] sm:$0xff]  ;;  %v537_v24 = vld [vmem:[%s1096_s4 + $0x38] sm:$0xff]  ;;  %s350_s19 = scalar_lea.vmem %s1094_s2, %s796_s16  ;;  %vm629_vm2 = vcmp.lt.s32.totalorder %v628_v47, 8 }
  0x13   : > { %808 = vmatprep.subr.mxu1 %v873_v1  ;;  %v367_v12 = vmul.f32 %v364_v10, %v363_v9  ;;  %558 = vmatpush1.msra.mxu0 %v543_v8  ;;  %v446_v21 = vld [vmem:[%s1095_s3] sm:$0xff]  ;;  %v536_v25 = vld [vmem:[%s1096_s4 + $0x30] sm:$0xff]  ;;  %v535_v26 = vld [vmem:[%s1096_s4 + $0x28] sm:$0xff] }
  0x14   : > { %809 = vmatpush3.msra.mxu1 %v368_v6  ;;  %559 = vmatprep.subr.mxu0 %v873_v1  ;;  %v538_v23 = vld [vmem:[%s1096_s4 + $0x40] sm:$0xff]  ;;  %v533_v28 = vld [vmem:[%s1096_s4 + $0x18] sm:$0xff]  ;;  %v532_v29 = vld [vmem:[%s1096_s4 + $0x10] sm:$0xff] }
  0x15   : > { %481 = vmatprep.subr.mxu1 %v453_v7  ;;  %811 = vmatmul.mubr.msk.f32.vlgmr.msra.gmra.mxu1 %vm372_vm1, %v367_v12  ;;  %v534_v27 = vld [vmem:[%s1096_s4 + $0x20] sm:$0xff]  ;;  %v531_v30 = vld [vmem:[%s1096_s4 + $0x8] sm:$0xff]  ;;  %v549_v32 = vld [vmem:[%s1096_s4 + $0x98] sm:$0xff] }
  0x16   : > { %560 = vmatpush1.msra.mxu0 %v542_v11  ;;  %482 = vmatpush1.msra.mxu1 %v452_v13  ;;  %v530_v31 = vld [vmem:[%s1096_s4] sm:$0xff]  ;;  %v548_v33 = vld [vmem:[%s1096_s4 + $0x90] sm:$0xff]  ;;  %v547_v34 = vld [vmem:[%s1096_s4 + $0x88] sm:$0xff] }
  0x17   : > { %521 = vmatprep.mubr.f32.mxu1 %v873_v1  ;;  %483 = vmatprep.subr.mxu1 %v451_v14  ;;  %v546_v35 = vld [vmem:[%s1096_s4 + $0x80] sm:$0xff]  ;;  %v366_v39 = vld [vmem:[%s350_s19 + $0x8] sm:$0xff] }
  0x18   : > { %561 = vmatprep.subr.mxu0 %v873_v1  ;;  %484 = vmatpush1.msra.mxu1 %v450_v15  ;;  %v365_v40 = vld [vmem:[%s350_s19] sm:$0xff] }
  0x19   : > { %562 = vmatpush1.msra.mxu0 %v541_v16  ;;  %485 = vmatprep.subr.mxu1 %v449_v17 }
  0x1a   : > { %563 = vmatprep.subr.mxu0 %v873_v1  ;;  %486 = vmatpush1.msra.mxu1 %v448_v18 }
  0x1b   : > { %564 = vmatpush1.msra.mxu0 %v540_v19  ;;  %487 = vmatprep.subr.mxu1 %v447_v20  ;;  %v671_v20 = vld [vmem:[#allocation2] sm:$0xff] }
  0x1c   : > { %565 = vmatprep.subr.mxu0 %v873_v1  ;;  %488 = vmatpush1.msra.mxu1 %v446_v21 }
  0x1d   : > { %566 = vmatpush1.msra.mxu0 %v539_v22  ;;  %791 = vmatmul.mubr.msk.f32.vlgmr.msra.gmra.mxu1 %vm372_vm1, %v363_v9 }
  0x1e   : > { %567 = vmatprep.subr.mxu0 %v873_v1 }
  0x1f   : > { %568 = vmatpush1.msra.mxu0 %v538_v23 }
  0x20   : > { %569 = vmatprep.subr.mxu0 %v873_v1 }
  0x21   : > { %570 = vmatpush1.msra.mxu0 %v537_v24 }
  0x22   : > { %571 = vmatprep.subr.mxu0 %v873_v1 }
  0x23   : > { %572 = vmatpush1.msra.mxu0 %v536_v25 }
  0x24   : > { %573 = vmatprep.subr.mxu0 %v873_v1 }
  0x25   : > { %574 = vmatpush1.msra.mxu0 %v535_v26 }
  0x26   : > { %575 = vmatprep.subr.mxu0 %v873_v1 }
  0x27   : > { %576 = vmatpush1.msra.mxu0 %v534_v27 }
  0x28   : > { %577 = vmatprep.subr.mxu0 %v873_v1 }
  0x29   : > { %578 = vmatpush1.msra.mxu0 %v533_v28 }
  0x2a   : > { %579 = vmatprep.subr.mxu0 %v873_v1 }
  0x2b   : > { %580 = vmatpush1.msra.mxu0 %v532_v29 }
  0x2c   : > { %581 = vmatprep.subr.mxu0 %v873_v1 }
  0x2d   : > { %582 = vmatpush1.msra.mxu0 %v531_v30 }
  0x2e   : > { %583 = vmatprep.subr.mxu0 %v873_v1 }
  0x2f   : > { %584 = vmatpush1.msra.mxu0 %v530_v31 }
  0x30   : > { %609 = vmatprep.subr.mxu0 %v873_v1 }
  0x31   : > { %610 = vmatpush2.msra.mxu0 %v549_v32 }
  0x32   : > { %611 = vmatprep.subr.mxu0 %v873_v1 }
  0x33   : > { %612 = vmatpush2.msra.mxu0 %v548_v33 }
  0x34   : > { %613 = vmatprep.subr.mxu0 %v873_v1 }
  0x35   : > { %614 = vmatpush2.msra.mxu0 %v547_v34 }
  0x36   : > { %615 = vmatprep.subr.mxu0 %v873_v1 }
  0x37   : > { %616 = vmatpush2.msra.mxu0 %v546_v35 }
  0xd5   : > { %v442_v36 = vpop.f32.mrf.mxu1 }
  0xd6   : > { %v630_v4 = vsel %vm629_vm2, %v442_v36, 0.0 }
  0xd7   : > { %v812_v37 = vpop.f32.mrf.mxu1  ;;  %v635_v5 = vand.u32 2147483647, %v630_v4  ;;  %v634_v17 = vmin.f32 %v630_v4, 0.0 }
  0xd9   : > { %v636_v6 = vsub.f32 0.0, %v635_v5 }
  0xdb   : > { %v637_v7 = vmul.f32 1.442695, %v636_v6 }
  0xdd   : > { %v523_v38 = vpop.f32.mrf.mxu1 }
  0xde   : > { %v528_v43 = vmul.f32 %v523_v38, %v365_v40 }
  0xdf   : > { %v525_v41 = vpop.f32.mrf.mxu1 }
  0xe0   : > { %v529_v42 = vmul.f32 %v525_v41, %v366_v39 }
  0xe2   : > { %792 = vmatprep.mubr.msk.f32.mxu0 %vm372_vm1, %v529_v42 }
  0xe3   : > { %618 = vmatmul.mubr.f32.vlgmr.msra.gmra.mxu0 %v528_v43 }
 0x1a3   : > { %v619_v48 = vpop.f32.mrf.mxu0 }
 0x1a4   : > { %v633_v49 = vsel %vm629_vm2, %v619_v48, 0.0 }
 0x1a5   : > { %v651_v50 = vand.u32 2147483647, %v633_v49  ;;  %v621_v51 = vpop.f32.mrf.mxu0  ;;  %v649_v58 = vsub.f32 0.0, %v633_v49 }
 0x1a7   : > { %v652_v52 = vsub.f32 0.0, %v651_v50  ;;  %v650_v63 = vmin.f32 %v649_v58, 0.0 }
 0x1a9   : > { %v653_v53 = vmul.f32 1.442695, %v652_v52 }
 0x1ab   : > { %841 = vpow2.f32 %v653_v53 }
 0x1b8   : > { %v842_v54 = vpop.eup %841 }
 0x1b9   : > { %v655_v55 = vadd.f32 1.0, %v842_v54  ;;  %v658_v56 = vmul.f32 -0.5, %v842_v54  ;;  %v661_v59 = vand.u32 2147483647, %v842_v54 }
 0x1bb   : > { %843 = vlog2.f32 %v655_v55  ;;  %v659_v57 = vadd.f32 1.0, %v658_v56  ;;  %vm662_vm3 = vcmp.lt.f32.partialorder %v661_v59, 0.0004427343 }
 0x1bc   : > { %845 = vpow2.f32 %v637_v7 }
 0x1bd   : > { %v660_v62 = vmul.f32 %v842_v54, %v659_v57 }
 0x1c8   : > { %v844_v60 = vpop.eup %843 }
 0x1c9   : > { %v657_v61 = vmul.f32 0.6931472, %v844_v60  ;;  %v846_v8 = vpop.eup %845 }
 0x1ca   : > { %v639_v9 = vadd.f32 1.0, %v846_v8  ;;  %v642_v10 = vmul.f32 -0.5, %v846_v8  ;;  %v645_v13 = vand.u32 2147483647, %v846_v8 }
 0x1cb   : > { %v663_v0 = vsel %vm662_vm3, %v660_v62, %v657_v61 }
 0x1cc   : > { %v664_v2 = vsub.f32 %v650_v63, %v663_v0  ;;  %847 = vlog2.f32 %v639_v9  ;;  %v643_v12 = vadd.f32 1.0, %v642_v10  ;;  %vm646_vm6 = vcmp.lt.f32.partialorder %v645_v13, 0.0004427343 }
 0x1ce   : > { %v666_v3 = vsel %vm665_vm4, %v664_v2, 0.0  ;;  %v644_v15 = vmul.f32 %v846_v8, %v643_v12 }
 0x1cf   : > { %667 = vadd.xlane.f32.xlu0 %v666_v3 }
 0x1d9   : > { %v848_v11 = vpop.eup %847 }
 0x1da   : > { %v641_v14 = vmul.f32 0.6931472, %v848_v11 }
 0x1dc   : > { %v647_v16 = vsel %vm646_vm6, %v644_v15, %v641_v14 }
 0x1dd   : > { %v648_v18 = vsub.f32 %v634_v17, %v647_v16 }
 0x258   : > { %v668_v1 = vpop.xlane.xlu0 %667 }
 0x259   : > { %v669_v19 = vadd.f32 %v668_v1, %v648_v18 }
 0x25b   : > { %v670_v21 = vsel %vm629_vm2, %v669_v19, 0.0 }
 0x25c   : > { %v672_v22 = vadd.f32 %v671_v20, %v670_v21 }
 0x25e   : > { %674 = vst.msk [vmem:[#allocation2] sm:$0xff] %vm361_vm5, %v672_v22 }
 0x265   : > { %v678_v23 = vld [vmem:[#allocation2] sm:$0xff] }
 0x266   : > { %v679_v24 = vsel %vm361_vm5, %v678_v23, 0.0 }
 0x267   : > { %680 = vadd.xlane.f32.xlu0 %v679_v24 }
 0x2f0   : > { %v681_v25 = vpop.xlane.xlu0 %680 }
 0x2f1   : > { %v682_v26 = vrot.slane %v681_v25, 4 }
 0x2f3   : > { %v683_v27 = vadd.f32 %v682_v26, %v681_v25 }
 0x2f5   : > { %v684_v28 = vrot.slane %v683_v27, 2 }
 0x2f7   : > { %v685_v29 = vadd.f32 %v684_v28, %v683_v27 }
 0x2f9   : > { %v686_v30 = vrot.slane %v685_v29, 1 }
 0x2fb   : > { %v687_v31 = vadd.f32 %v686_v30, %v685_v29 }
 0x2fd   : > { %813 = vpush %v687_v31 }
 0x32e   : > { %s814_s27 = spop %813 }
 0x32f   : > { %v689_v32 = vstv %s814_s27 }
 0x330   : > { %692 = vst.msk [vmem:[%s356_s26] sm:$0x1] %vm691_vm7, %v689_v32 }
 0x331 PF: > { %s16_s23 = sadd.s32 1, %s871_s23   ;;  %s1099_s21 = smov %s867_s22 }
 0x332   : > { %p13_p6 = scmp.ge.s32.totalorder %s16_s23, 4   ;;  %s1100_s22 = smov %s1102_s24 }
 0x334   :  { %15 = sbr.rel (!%p13_p6) target bundleno = 2 (0x2), region = 88 }

</bundles_post_ra>
